<compile_context>
chip_gen: v5e
topology: v5e:2x2
jax: 0.10.0
libtpu: 0.0.40
codegen_flags: <defaults>
</compile_context>

<pallas_src>
import jax
import jax.numpy as jnp
from jax.experimental import pallas as pl
from jax.experimental.pallas import tpu as pltpu

BN_EPS = 1e-5


def linear_block_kernel(z_ref, wt_ref, b_ref, gamma_ref, beta_ref, o_ref):
    # ----- Linear: bf16 MXU matmul, f32 accumulation -------------------------
    z = z_ref[...].astype(jnp.bfloat16)        # (B, in)  activations -> bf16
    wt = wt_ref[...]                           # (in, tn) pre-transposed bf16 weight
    y = jnp.dot(z, wt, preferred_element_type=jnp.float32) + b_ref[...]  # (B, tn) f32

    # ----- Mish: y * tanh(softplus(y)) with ONE transcendental ---------------
    # t = exp(-|y|) is always in (0, 1] -> no overflow in either branch.
    t = jnp.exp(-jnp.abs(y))
    two_t = 2.0 * t
    t2 = t * t
    pos = y >= 0.0
    num = jnp.where(pos, 1.0 + two_t, t2 + two_t)
    den = jnp.where(pos, 1.0 + two_t + 2.0 * t2, t2 + two_t + 2.0)
    m = y * num * pl.reciprocal(den, approx=True)          # (B, tn) f32

    # ----- BatchNorm1d (training mode): single-pass per-feature batch stats --
    mean = jnp.mean(m, axis=0, keepdims=True)               # (1, tn)
    msq = jnp.mean(m * m, axis=0, keepdims=True)            # (1, tn)
    var = jnp.maximum(msq - mean * mean, 0.0)                # biased var, clamp cancellation
    inv_std = jax.lax.rsqrt(var + BN_EPS)

    # Fold the BN affine into a per-feature scale/shift (2 VALU ops / element).
    scale = gamma_ref[...] * inv_std                         # (1, tn)
    shift = beta_ref[...] - mean * scale                     # (1, tn)
    o_ref[...] = (m * scale + shift).astype(o_ref.dtype)
    # TODO(synk): BatchNorm1d running_mean / running_var are not updated
    # (forward normalization only; PyTorch training-state side effect omitted).


def prepare_params(w, b, gamma, beta):
    """One-time parameter prep (do NOT run per call): pre-transpose the Linear
    weight to (in_size, out_size) and cast it to bf16 for the MXU."""
    return (jnp.asarray(w).T.astype(jnp.bfloat16),
            jnp.asarray(b, jnp.float32),
            jnp.asarray(gamma, jnp.float32),
            jnp.asarray(beta, jnp.float32))


def linear_block(z, wt, b, gamma, beta, *, tn=None):
    """Fused Linear -> Mish -> BatchNorm1d.

    z:  (B, in_size) f32
    wt: (in_size, out_size) bf16 — PRE-transposed weight (see prepare_params)
    b / gamma / beta: (out_size,) f32
    """
    B, in_size = z.shape
    out_size = wt.shape[1]

    # Tile only the output-feature axis: BN stats are per-feature, so N-tiles
    # are fully independent (no cross-tile reduction needed).
    if tn is None:
        tn = next((c for c in (512, 256, 128)
                   if out_size > c and out_size % c == 0), out_size)
    assert out_size % tn == 0, (out_size, tn)
    grid = (out_size // tn,)

    b2 = b.reshape(1, out_size)
    g2 = gamma.reshape(1, out_size)
    be2 = beta.reshape(1, out_size)

    cost = pl.CostEstimate(
        flops=2 * B * in_size * out_size,
        transcendentals=2 * B * out_size,            # exp + approx-reciprocal
        bytes_accessed=(z.size * z.dtype.itemsize
                        + wt.size * wt.dtype.itemsize
                        + 3 * out_size * 4
                        + B * out_size * 4),
    )

    return pl.pallas_call(
        linear_block_kernel,
        out_shape=jax.ShapeDtypeStruct((B, out_size), jnp.float32),
        grid_spec=pltpu.PrefetchScalarGridSpec(
            num_scalar_prefetch=0,
            grid=grid,
            in_specs=[
                pl.BlockSpec((B, in_size), lambda j: (0, 0)),    # z: resident
                pl.BlockSpec((in_size, tn), lambda j: (0, j)),   # W slab: pipelined
                pl.BlockSpec((1, tn), lambda j: (0, j)),         # bias
                pl.BlockSpec((1, tn), lambda j: (0, j)),         # gamma
                pl.BlockSpec((1, tn), lambda j: (0, j)),         # beta
            ],
            out_specs=pl.BlockSpec((B, tn), lambda j: (0, j)),   # lane-dense output
        ),
        compiler_params=pltpu.CompilerParams(
            dimension_semantics=("parallel",),   # shard N-tiles across v7x's 2 TCs
            vmem_limit_bytes=32 * 1024 * 1024,
        ),
        cost_estimate=cost,
    )(z, wt, b2, g2, be2)


if __name__ == "__main__":
    B, in_size, out_size = 8, 32, 128

    key = jax.random.PRNGKey(0)
    kz, kw, kb = jax.random.split(key, 3)

    z = jax.random.normal(kz, (B, in_size), dtype=jnp.float32)

    # Deterministic parameter init (PyTorch-like uniform for Linear; BN defaults).
    bound = 1.0 / (in_size ** 0.5)
    w = jax.random.uniform(kw, (out_size, in_size), jnp.float32, -bound, bound)
    b = jax.random.uniform(kb, (out_size,), jnp.float32, -bound, bound)
    gamma = jnp.ones((out_size,), jnp.float32)    # BatchNorm1d weight init
    beta = jnp.zeros((out_size,), jnp.float32)    # BatchNorm1d bias init

    # One-time param prep (pre-transpose + bf16 weight).
    wt_bf16, b_p, g_p, be_p = prepare_params(w, b, gamma, beta)

    out = linear_block(z, wt_bf16, b_p, g_p, be_p)
    jax.block_until_ready(out)

    # Reference: same bf16 MXU feed, exact Mish, two-pass variance.
    y_ref = jnp.dot(z.astype(jnp.bfloat16), wt_bf16,
                    preferred_element_type=jnp.float32) + b
    m_ref = y_ref * jnp.tanh(jax.nn.softplus(y_ref))
    mu = m_ref.mean(axis=0, keepdims=True)
    var = ((m_ref - mu) ** 2).mean(axis=0, keepdims=True)
    ref = gamma * (m_ref - mu) / jnp.sqrt(var + BN_EPS) + beta

    # Tolerance absorbs the approx-reciprocal and single-pass-variance deltas.
    assert jnp.allclose(out, ref, atol=2e-2, rtol=2e-2), float(
        jnp.max(jnp.abs(out - ref)))

    print("KERNEL_OK")
</pallas_src>

<mosaic_0001>
module attributes {stable_mosaic.version = 11 : i64} {
  func.func @linear_block_kernel(%arg0: i32, %arg1: memref<8x32xf32, #tpu.memory_space<vmem>>, %arg2: memref<32x128xbf16, #tpu.memory_space<vmem>>, %arg3: memref<1x128xf32, #tpu.memory_space<vmem>>, %arg4: memref<1x128xf32, #tpu.memory_space<vmem>>, %arg5: memref<1x128xf32, #tpu.memory_space<vmem>>, %arg6: memref<8x128xf32, #tpu.memory_space<vmem>>) attributes {dimension_semantics = [#tpu.dimension_semantics<parallel>], iteration_bounds = array<i64: 1>, scalar_prefetch = 0 : i64, scratch_operands = 0 : i64, tpu.core_type = #tpu.core_type<tc>, window_params = [{pipeline_mode = #tpu.pipeline_mode<synchronous>, transform_indices = @transform_0, window_bounds = array<i64: 8, 32>}, {transform_indices = @transform_1, window_bounds = array<i64: 32, 128>}, {transform_indices = @transform_2, window_bounds = array<i64: 1, 128>}, {transform_indices = @transform_3, window_bounds = array<i64: 1, 128>}, {transform_indices = @transform_4, window_bounds = array<i64: 1, 128>}, {transform_indices = @transform_5, window_bounds = array<i64: 8, 128>}]} {
    %c0 = arith.constant 0 : index
    %c0_0 = arith.constant 0 : index
    %0 = vector.load %arg1[%c0, %c0_0] : memref<8x32xf32, #tpu.memory_space<vmem>>, vector<8x32xf32>
    %1 = arith.truncf %0 : vector<8x32xf32> to vector<8x32xbf16>
    %c0_1 = arith.constant 0 : index
    %c0_2 = arith.constant 0 : index
    %2 = vector.load %arg2[%c0_1, %c0_2] : memref<32x128xbf16, #tpu.memory_space<vmem>>, vector<32x128xbf16>
    %cst = arith.constant dense<0.000000e+00> : vector<8x128xf32>
    %3 = tpu.matmul %1, %2, %cst {dimension_numbers = #tpu.dot_dimension_numbers<[1], [0], [0], [1], [0, 0, 1, 1], [], []>} : vector<8x32xbf16>, vector<32x128xbf16>, vector<8x128xf32> -> vector<8x128xf32>
    %c0_3 = arith.constant 0 : index
    %c0_4 = arith.constant 0 : index
    %4 = vector.load %arg3[%c0_3, %c0_4] : memref<1x128xf32, #tpu.memory_space<vmem>>, vector<1x128xf32>
    %5 = vector.broadcast %4 : vector<1x128xf32> to vector<8x128xf32>
    %6 = arith.addf %3, %5 : vector<8x128xf32>
    %7 = math.absf %6 : vector<8x128xf32>
    %cst_5 = arith.constant 0.000000e+00 : f32
    %8 = vector.broadcast %cst_5 : f32 to vector<8x128xf32>
    %9 = arith.subf %8, %7 : vector<8x128xf32>
    %10 = math.exp %9 : vector<8x128xf32>
    %cst_6 = arith.constant 2.000000e+00 : f32
    %11 = vector.broadcast %cst_6 : f32 to vector<8x128xf32>
    %12 = arith.mulf %11, %10 : vector<8x128xf32>
    %13 = arith.mulf %10, %10 : vector<8x128xf32>
    %cst_7 = arith.constant 0.000000e+00 : f32
    %14 = vector.broadcast %cst_7 : f32 to vector<8x128xf32>
    %15 = arith.cmpf oge, %6, %14 : vector<8x128xf32>
    %cst_8 = arith.constant 1.000000e+00 : f32
    %16 = vector.broadcast %cst_8 : f32 to vector<8x128xf32>
    %17 = arith.addf %16, %12 : vector<8x128xf32>
    %18 = arith.addf %13, %12 : vector<8x128xf32>
    %19 = arith.select %15, %17, %18 : vector<8x128xi1>, vector<8x128xf32>
    %cst_9 = arith.constant 1.000000e+00 : f32
    %20 = vector.broadcast %cst_9 : f32 to vector<8x128xf32>
    %21 = arith.addf %20, %12 : vector<8x128xf32>
    %cst_10 = arith.constant 2.000000e+00 : f32
    %22 = vector.broadcast %cst_10 : f32 to vector<8x128xf32>
    %23 = arith.mulf %22, %13 : vector<8x128xf32>
    %24 = arith.addf %21, %23 : vector<8x128xf32>
    %25 = arith.addf %13, %12 : vector<8x128xf32>
    %cst_11 = arith.constant 2.000000e+00 : f32
    %26 = vector.broadcast %cst_11 : f32 to vector<8x128xf32>
    %27 = arith.addf %25, %26 : vector<8x128xf32>
    %28 = arith.select %15, %24, %27 : vector<8x128xi1>, vector<8x128xf32>
    %29 = arith.mulf %6, %19 : vector<8x128xf32>
    %30 = tpu.reciprocal %28 {approx = true} : vector<8x128xf32> -> vector<8x128xf32>
    %31 = arith.mulf %29, %30 : vector<8x128xf32>
    %cst_12 = arith.constant dense<0.000000e+00> : vector<128xf32>
    %32 = vector.multi_reduction <add>, %31, %cst_12 [0] : vector<8x128xf32> to vector<128xf32>
    %33 = vector.shape_cast %32 : vector<128xf32> to vector<1x128xf32>
    %cst_13 = arith.constant 8.000000e+00 : f32
    %34 = vector.broadcast %cst_13 : f32 to vector<1x128xf32>
    %35 = arith.divf %33, %34 : vector<1x128xf32>
    %36 = arith.mulf %31, %31 : vector<8x128xf32>
    %cst_14 = arith.constant dense<0.000000e+00> : vector<128xf32>
    %37 = vector.multi_reduction <add>, %36, %cst_14 [0] : vector<8x128xf32> to vector<128xf32>
    %38 = vector.shape_cast %37 : vector<128xf32> to vector<1x128xf32>
    %cst_15 = arith.constant 8.000000e+00 : f32
    %39 = vector.broadcast %cst_15 : f32 to vector<1x128xf32>
    %40 = arith.divf %38, %39 : vector<1x128xf32>
    %41 = arith.mulf %35, %35 : vector<1x128xf32>
    %42 = arith.subf %40, %41 : vector<1x128xf32>
    %cst_16 = arith.constant 0.000000e+00 : f32
    %43 = vector.broadcast %cst_16 : f32 to vector<1x128xf32>
    %44 = arith.maximumf %42, %43 : vector<1x128xf32>
    %cst_17 = arith.constant 9.99999974E-6 : f32
    %45 = vector.broadcast %cst_17 : f32 to vector<1x128xf32>
    %46 = arith.addf %44, %45 : vector<1x128xf32>
    %47 = math.rsqrt %46 : vector<1x128xf32>
    %c0_18 = arith.constant 0 : index
    %c0_19 = arith.constant 0 : index
    %48 = vector.load %arg4[%c0_18, %c0_19] : memref<1x128xf32, #tpu.memory_space<vmem>>, vector<1x128xf32>
    %49 = arith.mulf %48, %47 : vector<1x128xf32>
    %c0_20 = arith.constant 0 : index
    %c0_21 = arith.constant 0 : index
    %50 = vector.load %arg5[%c0_20, %c0_21] : memref<1x128xf32, #tpu.memory_space<vmem>>, vector<1x128xf32>
    %51 = arith.mulf %35, %49 : vector<1x128xf32>
    %52 = arith.subf %50, %51 : vector<1x128xf32>
    %53 = vector.broadcast %49 : vector<1x128xf32> to vector<8x128xf32>
    %54 = arith.mulf %31, %53 : vector<8x128xf32>
    %55 = vector.broadcast %52 : vector<1x128xf32> to vector<8x128xf32>
    %56 = arith.addf %54, %55 : vector<8x128xf32>
    %c0_22 = arith.constant 0 : index
    %c0_23 = arith.constant 0 : index
    %57 = vector.load %arg6[%c0_22, %c0_23] : memref<8x128xf32, #tpu.memory_space<vmem>>, vector<8x128xf32>
    tpu.vector_store %arg6[%c0_22, %c0_23], %56 {strides = array<i32>} : memref<8x128xf32, #tpu.memory_space<vmem>>, vector<8x128xf32>,
    return
  }
  func.func @transform_0(%arg0: i32) -> (i32, i32) {
    %c0_i32 = arith.constant 0 : i32
    %c0_i32_0 = arith.constant 0 : i32
    %c0_i32_1 = arith.constant 0 : i32
    return %c0_i32, %c0_i32_0 : i32, i32
  }
  func.func @transform_1(%arg0: i32) -> (i32, i32) {
    %c0_i32 = arith.constant 0 : i32
    %c0_i32_0 = arith.constant 0 : i32
    return %c0_i32, %arg0 : i32, i32
  }
  func.func @transform_2(%arg0: i32) -> (i32, i32) {
    %c0_i32 = arith.constant 0 : i32
    %c0_i32_0 = arith.constant 0 : i32
    return %c0_i32, %arg0 : i32, i32
  }
  func.func @transform_3(%arg0: i32) -> (i32, i32) {
    %c0_i32 = arith.constant 0 : i32
    %c0_i32_0 = arith.constant 0 : i32
    return %c0_i32, %arg0 : i32, i32
  }
  func.func @transform_4(%arg0: i32) -> (i32, i32) {
    %c0_i32 = arith.constant 0 : i32
    %c0_i32_0 = arith.constant 0 : i32
    return %c0_i32, %arg0 : i32, i32
  }
  func.func @transform_5(%arg0: i32) -> (i32, i32) {
    %c0_i32 = arith.constant 0 : i32
    %c0_i32_0 = arith.constant 0 : i32
    return %c0_i32, %arg0 : i32, i32
  }
}

</mosaic_0001>

<bundles_post_ra>
// kernel: tpu_custom_call.1
= control target key start
LH: loop header
LB: loop body
LE: loop exit
PB: predicated region body
PF: predicated region fallthrough
CT: control target
= control target key end

     0   :  { %10 = vsyncpa [#allocation3], 0  ;;  %s334_s0 = inlined_call_operand.hbm [shape: f32[8,32], index: 0, kind: input, shape index: {}]   ;;  %s335_s1 = inlined_call_operand.hbm [shape: bf16[32,128], index: 1, kind: input, shape index: {}]   ;;  %s336_s2 = inlined_call_operand.vmem [shape: f32[1,128], index: 2, kind: input, shape index: {}]   ;;  %s337_s3 = inlined_call_operand.vmem [shape: f32[1,128], index: 3, kind: input, shape index: {}]   ;;  %s338_s4 = inlined_call_operand.vmem [shape: f32[1,128], index: 4, kind: input, shape index: {}]   ;;  %s339_s5 = inlined_call_operand.hbm [shape: f32[8,128], index: 5, kind: output, shape index: {}]  }
   0x1   :  { %11 = vsyncpa [#allocation6], 0 }
   0x2   :  { %12 = vsyncpa [#allocation4], 0  ;;  %s18_s20 = sshll.u32 %s334_s0, 4  ;;  %s280_s21 = smov [#allocation2]   ;;  %s19_s20 = int_to_ptr.hbm [resolvable:$true] %s18_s20 }
   0x3   :  { %s20_s22 = sshll.u32 %s280_s21, 4  ;;  %s28_s25 = sshll.u32 %s335_s1, 4  ;;  %s21_s22 = int_to_ptr.vmem [resolvable:$true] %s20_s22  ;;  %s29_s25 = int_to_ptr.hbm [resolvable:$true] %s28_s25 }
   0x4   :  { %23 = dma.hbm_to_vmem [thread:$0]  %s19_s20, 128, %s21_s22, [#allocation3]  }
   0x5   :  { %s281_s26 = smov [#allocation5]   ;;  %s282_s28 = smov 64  }
   0x6   :  { %s30_s27 = sshll.u32 %s281_s26, 4  ;;  %s283_s29 = smov 4   ;;  %s31_s27 = int_to_ptr.vmem [resolvable:$true] %s30_s27 }
   0x7   :  { %36 = dma.hbm_to_vmem [thread:$0]  %s29_s25, 256, %s31_s27, [#allocation6], %s282_s28, %s282_s28, %s283_s29  }
   0x8   :  { %274 = dma.done.wait [#allocation3], 128  }
   0x9   :  { %275 = vsyncadd [#allocation3], 4294967168 }
   0xa   :  { %276 = dma.done.wait [#allocation6], 256  }
   0xb   :  { %277 = vsyncadd [#allocation6], 4294967040  ;;  %v186_v0 = vld [vmem:[#allocation5 + $0x8] sm:$0xff]  ;;  %v185_v1 = vld [vmem:[#allocation5] sm:$0xff]  ;;  %vm74_vm0 = vcmask 261120   ;;  %v284_v14 = vmov 8.0  }
   0xc   :  { %84 = vmatpush.bf16.msra.mxu0 %v186_v0  ;;  %v52_v2 = vld [vmem:[#allocation2] sm:$0xff]  ;;  %s285_s8 = smov [#allocation7]   ;;  %s165_s12 = sshll.u32 %s339_s5, 4  ;;  %s166_s12 = int_to_ptr.hbm [resolvable:$true] %s165_s12 }
   0xd   :  { %v53_v3 = vpack.c.bf16 %v52_v2, %v52_v2  ;;  %v193_v4 = vld [vmem:[%s336_s2] ss:$0 sm:$0xff]  ;;  %s163_s9 = sshll.u32 %s285_s8, 4  ;;  %s164_s9 = int_to_ptr.vmem [resolvable:$true] %s163_s9 }
   0xe   :  { %v144_v56 = vld [vmem:[%s337_s3] sm:$0x1] }
   0xf   :  { %v146_v59 = vld [vmem:[%s338_s4] sm:$0x1] }
  0x10   :  { %85 = vmatpush.bf16.msra.mxu0 %v185_v1 }
  0x13   :  { %184 = vmatmul.msk.bf16.vlgmr.msra.gmra.mxu0 %vm74_vm0, %v53_v3 }
  0x90   :  { %v87_v5 = vpop.f32.mrf.mxu0 }
  0x91   :  { %v88_v6 = vadd.f32 %v193_v4, %v87_v5 }
  0x93   :  { %v91_v7 = vand.u32 2147483647, %v88_v6  ;;  %vm97_vm1 = vcmp.ge.f32.partialorder %v88_v6, 0.0 }
  0x95   :  { %v92_v8 = vsub.f32 0.0, %v91_v7 }
  0x97   :  { %v93_v9 = vmul.f32 1.442695, %v92_v8 }
  0x98   :  { %v89_v10 = vpop.f32.mrf.mxu0 }
  0x99   :  { %194 = vpow2.f32 %v93_v9 }
  0x9a   :  { %196 = vrcp.f32 %v284_v14 }
  0x9f   :  { %v195_v11 = vpop.eup %194 }
  0xa0   :  { %v95_v12 = vmul.f32 2.0, %v195_v11  ;;  %v96_v13 = vmul.f32 %v195_v11, %v195_v11  ;;  %v197_v20 = vpop.eup %196 }
  0xa1   :  { %v115_v23 = vmul.f32 8.0, %v197_v20  ;;  %vm119_vm2 = vweird.f32 %v197_v20 }
  0xa2   :  { %v98_v15 = vadd.f32 1.0, %v95_v12  ;;  %v99_v16 = vadd.f32 %v96_v13, %v95_v12  ;;  %v101_v17 = vmul.f32 2.0, %v96_v13 }
  0xa3   :  { %v116_v26 = vsub.f32 1.0, %v115_v23 }
  0xa4   :  { %v102_v18 = vadd.f32 %v101_v17, %v98_v15  ;;  %v103_v19 = vadd.f32 2.0, %v99_v16  ;;  %v100_v22 = vsel %vm97_vm1, %v98_v15, %v99_v16 }
  0xa5   :  { %v105_v24 = vmul.f32 %v100_v22, %v88_v6  ;;  %v117_v30 = vmul.f32 %v197_v20, %v116_v26 }
  0xa6   :  { %v104_v21 = vsel %vm97_vm1, %v102_v18, %v103_v19 }
  0xa7   :  { %198 = vrcp.f32 %v104_v21  ;;  %v118_v35 = vadd.f32 %v197_v20, %v117_v30 }
  0xa9   :  { %v120_v40 = vsel %vm119_vm2, %v197_v20, %v118_v35 }
  0xad   :  { %v199_v25 = vpop.eup %198 }
  0xae   :  { %v107_v27 = vmul.f32 %v199_v25, %v105_v24 }
  0xb0   :  { %v108_v28 = vrot.slane %v107_v27, 4  ;;  %v122_v29 = vmul.f32 %v107_v27, %v107_v27 }
  0xb2   :  { %v109_v31 = vadd.f32 %v108_v28, %v107_v27  ;;  %v123_v32 = vrot.slane %v122_v29, 4 }
  0xb4   :  { %v110_v33 = vrot.slane %v109_v31, 2  ;;  %v124_v34 = vadd.f32 %v123_v32, %v122_v29 }
  0xb6   :  { %v125_v36 = vrot.slane %v124_v34, 2  ;;  %v111_v37 = vadd.f32 %v110_v33, %v109_v31 }
  0xb8   :  { %v112_v38 = vrot.slane %v111_v37, 1  ;;  %v126_v39 = vadd.f32 %v125_v36, %v124_v34 }
  0xba   :  { %v113_v41 = vadd.f32 %v112_v38, %v111_v37  ;;  %v127_v42 = vrot.slane %v126_v39, 1 }
  0xbc   :  { %v121_v43 = vmul.f32 %v120_v40, %v113_v41  ;;  %v128_v44 = vadd.f32 %v127_v42, %v126_v39 }
  0xbe   :  { %v129_v45 = vmul.f32 %v128_v44, %v120_v40  ;;  %v130_v46 = vmul.f32 %v121_v43, %v121_v43 }
  0xc0   :  { %v131_v47 = vsub.f32 %v129_v45, %v130_v46 }
  0xc2   :  { %v132_v48 = vmax.f32 %v131_v47, 0.0 }
  0xc4   :  { %v133_v49 = vadd.f32 1e-05, %v132_v48 }
  0xc6   :  { %200 = vrsqrt.f32 %v133_v49  ;;  %vm140_vm4 = vweird.f32 %v133_v49 }
  0xcc   :  { %v201_v50 = vpop.eup %200 }
  0xcd   :  { %v135_v51 = vmul.f32 %v201_v50, %v133_v49  ;;  %vm141_vm3 = vweird.f32 %v201_v50 }
  0xce   :  { %vm142_vm5 = vmor %vm140_vm4, %vm141_vm3 }
  0xcf   :  { %v136_v52 = vmul.f32 %v201_v50, %v135_v51 }
  0xd1   :  { %v137_v53 = vmul.f32 0.5, %v136_v52 }
  0xd3   :  { %v138_v54 = vsub.f32 1.5, %v137_v53 }
  0xd5   :  { %v139_v55 = vmul.f32 %v201_v50, %v138_v54 }
  0xd7   :  { %v143_v57 = vsel %vm142_vm5, %v201_v50, %v139_v55 }
  0xd8   :  { %v145_v58 = vmul.f32 %v144_v56, %v143_v57 }
  0xda   :  { %v147_v60 = vmul.f32 %v145_v58, %v121_v43  ;;  %v150_v61 = vperm.slane %v145_v58, 0 }
  0xdc   :  { %v148_v62 = vsub.f32 %v146_v59, %v147_v60  ;;  %v152_v63 = vmul.f32 %v150_v61, %v107_v27 }
  0xde   :  { %v154_v0 = vperm.slane %v148_v62, 0 }
  0xe0   :  { %v156_v1 = vadd.f32 %v154_v0, %v152_v63 }
  0xe2   :  { %157 = vst [vmem:[#allocation7] sm:$0xff] %v156_v1 }
  0xe3   :  { %168 = dma.vmem_to_hbm [thread:$0]  %s164_s9, 128, %s166_s12, [#allocation4]  }
  0xe4   :  { %278 = dma.done.wait [#allocation4], 128  }
  0xe5   :  { %279 = vsyncadd [#allocation4], 4294967168 }
  0xe6   :  { %173 = vsyncpa [#allocation3], 1 }
  0xe7   :  { %174 = vsyncpa [#allocation6], 1 }
  0xe8   :  { %175 = vsyncpa [#allocation4], 1 }

</bundles_post_ra>
